<compile_context>
chip_gen: v7x
topology: tpu7x:2x2x1
jax: 0.10.0
libtpu: 0.0.40
codegen_flags: <defaults>
</compile_context>

<pallas_src>
import math
from functools import partial

import jax
import jax.numpy as jnp
from jax.experimental import pallas as pl
from jax.experimental.pallas import tpu as pltpu

_LANE = 128
_MIB = 1 << 20


def _round_up(x, m):
    return ((x + m - 1) // m) * m


def _pad2(a, rows, cols):
    return jnp.pad(a, ((0, rows - a.shape[0]), (0, cols - a.shape[1])))


# --------------------------------------------------------------------------
# Fused single-kernel forward (small / medium graphs)
# --------------------------------------------------------------------------
def _fused_gcn_kernel(x_ref, adj_ref, w1_ref, b1_ref, w2_ref, b2_ref, o_ref):
    # layer 1: h = relu(adj @ (x @ W1) + b1)
    s1 = jnp.dot(x_ref[...], w1_ref[...], preferred_element_type=jnp.float32)
    h = jnp.dot(adj_ref[...], s1.astype(jnp.bfloat16),
                preferred_element_type=jnp.float32)
    h = jnp.maximum(h + b1_ref[...], 0.0)
    # TODO(synk): F.dropout(training=True) has no deterministic equivalent here;
    # eval-mode (identity) semantics are used.
    # layer 2: out = adj @ (h @ W2) + b2
    s2 = jnp.dot(h.astype(jnp.bfloat16), w2_ref[...],
                 preferred_element_type=jnp.float32)
    out = jnp.dot(adj_ref[...], s2.astype(jnp.bfloat16),
                  preferred_element_type=jnp.float32)
    o_ref[...] = (out + b2_ref[...]).astype(o_ref.dtype)


def _fused_forward(x_p, adj_p, w1_p, b1_p, w2_p, b2_p):
    n_p = adj_p.shape[0]
    nout_p = w2_p.shape[1]
    # No grid: every operand lives fully in VMEM; one kernel invocation.
    return pl.pallas_call(
        _fused_gcn_kernel,
        out_shape=jax.ShapeDtypeStruct((n_p, nout_p), jnp.float32),
        compiler_params=pltpu.CompilerParams(vmem_limit_bytes=40 * _MIB),
    )(x_p, adj_p, w1_p, b1_p, w2_p, b2_p)


# --------------------------------------------------------------------------
# Kernel 1 (tiled path): dense feature transform   support = x @ W
# --------------------------------------------------------------------------
def _dense_kernel(x_ref, w_ref, o_ref):
    o_ref[...] = jnp.dot(
        x_ref[...], w_ref[...], preferred_element_type=jnp.float32
    ).astype(o_ref.dtype)


def _dense(x, w, out_dtype, tm):
    n, fin = x.shape
    fout = w.shape[1]
    return pl.pallas_call(
        _dense_kernel,
        out_shape=jax.ShapeDtypeStruct((n, fout), out_dtype),
        grid_spec=pltpu.PrefetchScalarGridSpec(
            num_scalar_prefetch=0,
            grid=(n // tm,),
            in_specs=[
                pl.BlockSpec((tm, fin), lambda i: (i, 0)),
                pl.BlockSpec((fin, fout), lambda i: (0, 0)),
            ],
            out_specs=pl.BlockSpec((tm, fout), lambda i: (i, 0)),
        ),
        compiler_params=pltpu.CompilerParams(dimension_semantics=("parallel",)),
    )(x, w)


# --------------------------------------------------------------------------
# Kernel 2 (tiled path): graph aggregation   out = act(adj @ support + b)
# --------------------------------------------------------------------------
def _make_agg_kernel(tk, relu, resident, use_scratch):
    def kernel(adj_ref, s_ref, b_ref, o_ref, *scratch):
        acc_ref = scratch[0] if use_scratch else o_ref  # f32 accumulator
        k = pl.program_id(1)
        last = pl.num_programs(1) - 1

        @pl.when(k == 0)
        def _():
            # bias folded into the accumulator init
            acc_ref[...] = jnp.broadcast_to(b_ref[...], acc_ref.shape)

        if resident:
            # support is fully VMEM-resident; slice the rows matching this adj
            # column block.
            off = pl.multiple_of(k * tk, tk)
            s_blk = s_ref[pl.ds(off, tk), :]
        else:
            s_blk = s_ref[...]

        acc_ref[...] += jnp.dot(adj_ref[...], s_blk,
                                preferred_element_type=jnp.float32)

        if use_scratch:
            @pl.when(k == last)
            def _():
                res = acc_ref[...]
                if relu:
                    res = jnp.maximum(res, 0.0)
                o_ref[...] = res.astype(o_ref.dtype)
        elif relu:
            @pl.when(k == last)
            def _():
                o_ref[...] = jnp.maximum(o_ref[...], 0.0)

    return kernel


def _aggregate(adj, support, b_row, out_dtype, tm, tk, relu, support_resident):
    n = adj.shape[0]
    fout = support.shape[1]
    # f32 output -> accumulate directly into the resident output block,
    # otherwise use an f32 VMEM scratch accumulator.
    use_scratch = jnp.dtype(out_dtype) != jnp.dtype(jnp.float32)

    if support_resident:
        s_spec = pl.BlockSpec((n, fout), lambda i, k: (0, 0))   # DMA'd once
    else:
        s_spec = pl.BlockSpec((tk, fout), lambda i, k: (k, 0))  # streamed over k

    kernel = _make_agg_kernel(tk=tk, relu=relu, resident=support_resident,
                              use_scratch=use_scratch)
    scratch = [pltpu.VMEM((tm, fout), jnp.float32)] if use_scratch else []

    return pl.pallas_call(
        kernel,
        out_shape=jax.ShapeDtypeStruct((n, fout), out_dtype),
        grid_spec=pltpu.PrefetchScalarGridSpec(
            num_scalar_prefetch=0,
            grid=(n // tm, n // tk),
            in_specs=[
                pl.BlockSpec((tm, tk), lambda i, k: (i, k)),
                s_spec,
                pl.BlockSpec((1, fout), lambda i, k: (0, 0)),
            ],
            out_specs=pl.BlockSpec((tm, fout), lambda i, k: (i, 0)),
            scratch_shapes=scratch,
        ),
        compiler_params=pltpu.CompilerParams(
            dimension_semantics=("parallel", "arbitrary")
        ),
    )(adj, support, b_row)


# --------------------------------------------------------------------------
# Full GCN forward
# --------------------------------------------------------------------------
def gcn_forward(x, adj, w1, b1, w2, b2, *, tile=512,
                force_tiled=False, support_resident_budget=8 * _MIB):
    n, nfeat = x.shape
    nhid = w1.shape[1]
    nout = w2.shape[1]

    # lane-dense feature padding (multiples of 128)
    nfeat_p = _round_up(nfeat, _LANE)
    nhid_p = _round_up(nhid, _LANE)
    nout_p = _round_up(nout, _LANE)

    # ----- small/medium graphs: single fully-fused kernel -----
    n_fused = _round_up(n, _LANE)
    fused_bytes = (
        n_fused * n_fused * 2                                   # adj (bf16)
        + n_fused * nfeat_p * 2                                 # x (bf16)
        + nfeat_p * nhid_p * 2 + nhid_p * nout_p * 2            # weights
        + n_fused * nout_p * 4                                  # output (f32)
        + n_fused * (nhid_p * (4 + 2) * 2 + nout_p * (4 + 2))   # in-kernel temps
    )
    if (not force_tiled) and fused_bytes <= 24 * _MIB:
        x_p = _pad2(x, n_fused, nfeat_p).astype(jnp.bfloat16)
        adj_p = _pad2(adj, n_fused, n_fused).astype(jnp.bfloat16)
        w1_p = _pad2(w1, nfeat_p, nhid_p).astype(jnp.bfloat16)
        w2_p = _pad2(w2, nhid_p, nout_p).astype(jnp.bfloat16)
        b1_p = jnp.pad(b1, (0, nhid_p - nhid)).reshape(1, -1).astype(jnp.float32)
        b2_p = jnp.pad(b2, (0, nout_p - nout)).reshape(1, -1).astype(jnp.float32)
        out = _fused_forward(x_p, adj_p, w1_p, b1_p, w2_p, b2_p)
        return out[:n, :nout]

    # ----- large graphs: tiled, pipelined path -----
    n_p = _round_up(n, tile)
    tm = tk = tile

    # dense-transform row tile: biggest of {2048,1024,512} dividing n_p whose
    # (tm_dense, fin) bf16 block stays <= 4 MiB (Pallas double-buffers it).
    tm_dense = tm
    for cand in (2048, 1024, 512):
        if n_p % cand == 0 and cand * max(nfeat_p, nhid_p) * 2 <= 4 * _MIB:
            tm_dense = cand
            break

    x_p = _pad2(x, n_p, nfeat_p).astype(jnp.bfloat16)
    adj_p = _pad2(adj, n_p, n_p).astype(jnp.bfloat16)
    w1_p = _pad2(w1, nfeat_p, nhid_p).astype(jnp.bfloat16)
    w2_p = _pad2(w2, nhid_p, nout_p).astype(jnp.bfloat16)
    b1_p = jnp.pad(b1, (0, nhid_p - nhid)).reshape(1, -1).astype(jnp.float32)
    b2_p = jnp.pad(b2, (0, nout_p - nout)).reshape(1, -1).astype(jnp.float32)

    def resident(fout_p):
        # x2: Pallas allocates two buffers even for a never-changing block.
        return 2 * n_p * fout_p * 2 <= support_resident_budget

    # ----- layer 1: h = relu(adj @ (x @ W1) + b1) -----
    # NOTE: padded rows of h become relu(b1) (nonzero if b1>0), but layer-2's
    # adj has zero columns for padded nodes, so they never leak into the
    # sliced output.
    s1 = _dense(x_p, w1_p, jnp.bfloat16, tm_dense)                 # (n_p, nhid_p)
    h = _aggregate(adj_p, s1, b1_p, jnp.bfloat16, tm, tk,
                   relu=True, support_resident=resident(nhid_p))

    # TODO(synk): F.dropout(training=True) has no deterministic equivalent here;
    # eval-mode (identity) semantics are used.

    # ----- layer 2: out = adj @ (h @ W2) + b2 -----
    s2 = _dense(h, w2_p, jnp.bfloat16, tm_dense)                   # (n_p, nout_p)
    out = _aggregate(adj_p, s2, b2_p, jnp.float32, tm, tk,
                     relu=False, support_resident=resident(nout_p))

    return out[:n, :nout]


# --------------------------------------------------------------------------
# Helpers / reference
# --------------------------------------------------------------------------
def xavier_uniform(key, fan_in, fan_out, dtype=jnp.float32):
    """Matches torch.nn.init.xavier_uniform_ (gain=1)."""
    bound = math.sqrt(6.0 / (fan_in + fan_out))
    return jax.random.uniform(key, (fan_in, fan_out), dtype, -bound, bound)


def reference_gcn(x, adj, w1, b1, w2, b2):
    h = jnp.maximum(adj @ (x @ w1) + b1, 0.0)
    return adj @ (h @ w2) + b2


def _make_inputs(key, n, nfeat, nhid, nout, zero_bias=True):
    kx, kadj, kw1, kw2, kb1, kb2 = jax.random.split(key, 6)
    x = jax.random.normal(kx, (n, nfeat), jnp.float32)
    # symmetric row-normalized adjacency (dense stand-in for torch.spmm's sparse adj)
    a = jax.random.uniform(kadj, (n, n), jnp.float32)
    a = (a > 0.8).astype(jnp.float32)
    a = a + a.T + jnp.eye(n, dtype=jnp.float32)
    a = jnp.minimum(a, 1.0)
    adj = a / jnp.sum(a, axis=1, keepdims=True)
    w1 = xavier_uniform(kw1, nfeat, nhid)
    w2 = xavier_uniform(kw2, nhid, nout)
    if zero_bias:   # matches reset_parameters()
        b1 = jnp.zeros((nhid,), jnp.float32)
        b2 = jnp.zeros((nout,), jnp.float32)
    else:           # nonzero biases exercise the bias-fold / padding logic
        b1 = 0.1 * jax.random.normal(kb1, (nhid,), jnp.float32)
        b2 = 0.1 * jax.random.normal(kb2, (nout,), jnp.float32)
    return x, adj, w1, b1, w2, b2


if __name__ == "__main__":
    key = jax.random.PRNGKey(0)
    k1, k2, _ = jax.random.split(key, 3)

    # --- small graph: fused single-kernel path (fresh module: zero biases) ---
    N, NFEAT, NHID, NOUT = 64, 32, 32, 16
    args = _make_inputs(k1, N, NFEAT, NHID, NOUT, zero_bias=True)
    out = jax.block_until_ready(jax.jit(gcn_forward)(*args))
    ref = reference_gcn(*args)
    assert out.shape == (N, NOUT)
    # bf16 operands (f32 accumulation) -> loosened tolerance vs the f32 reference
    assert jnp.allclose(out, ref, atol=5e-2, rtol=5e-2), "fused path mismatch"

    # --- tiled path, VMEM-resident support (nonzero biases) ---
    N2 = 640
    args2 = _make_inputs(k2, N2, NFEAT, NHID, NOUT, zero_bias=False)
    tiled = jax.jit(partial(gcn_forward, force_tiled=True))
    out2 = jax.block_until_ready(tiled(*args2))
    ref2 = reference_gcn(*args2)
    assert out2.shape == (N2, NOUT)
    assert jnp.allclose(out2, ref2, atol=5e-2, rtol=5e-2), "tiled resident path mismatch"

    # --- tiled path, streamed (k-blocked) support ---
    tiled_stream = jax.jit(partial(gcn_forward, force_tiled=True,
                                   support_resident_budget=0))
    out3 = jax.block_until_ready(tiled_stream(*args2))
    assert jnp.allclose(out3, ref2, atol=5e-2, rtol=5e-2), "tiled streamed path mismatch"

    print("KERNEL_OK")
</pallas_src>

<mosaic_0001>
module attributes {stable_mosaic.version = 11 : i64} {
  func.func @_fused_gcn_kernel(%arg0: memref<128x128xbf16, #tpu.memory_space<vmem>>, %arg1: memref<128x128xbf16, #tpu.memory_space<vmem>>, %arg2: memref<128x128xbf16, #tpu.memory_space<vmem>>, %arg3: memref<1x128xf32, #tpu.memory_space<vmem>>, %arg4: memref<128x128xbf16, #tpu.memory_space<vmem>>, %arg5: memref<1x128xf32, #tpu.memory_space<vmem>>, %arg6: memref<128x128xf32, #tpu.memory_space<vmem>>) attributes {dimension_semantics = [], scalar_prefetch = 0 : i64, scratch_operands = 0 : i64, tpu.core_type = #tpu.core_type<tc>} {
    %c0 = arith.constant 0 : index
    %c0_0 = arith.constant 0 : index
    %0 = vector.load %arg0[%c0, %c0_0] : memref<128x128xbf16, #tpu.memory_space<vmem>>, vector<128x128xbf16>
    %c0_1 = arith.constant 0 : index
    %c0_2 = arith.constant 0 : index
    %1 = vector.load %arg2[%c0_1, %c0_2] : memref<128x128xbf16, #tpu.memory_space<vmem>>, vector<128x128xbf16>
    %cst = arith.constant dense<0.000000e+00> : vector<128x128xf32>
    %2 = tpu.matmul %0, %1, %cst {dimension_numbers = #tpu.dot_dimension_numbers<[1], [0], [0], [1], [0, 0, 1, 1], [], []>} : vector<128x128xbf16>, vector<128x128xbf16>, vector<128x128xf32> -> vector<128x128xf32>
    %c0_3 = arith.constant 0 : index
    %c0_4 = arith.constant 0 : index
    %3 = vector.load %arg1[%c0_3, %c0_4] : memref<128x128xbf16, #tpu.memory_space<vmem>>, vector<128x128xbf16>
    %4 = arith.truncf %2 : vector<128x128xf32> to vector<128x128xbf16>
    %cst_5 = arith.constant dense<0.000000e+00> : vector<128x128xf32>
    %5 = tpu.matmul %3, %4, %cst_5 {dimension_numbers = #tpu.dot_dimension_numbers<[1], [0], [0], [1], [0, 0, 1, 1], [], []>} : vector<128x128xbf16>, vector<128x128xbf16>, vector<128x128xf32> -> vector<128x128xf32>
    %c0_6 = arith.constant 0 : index
    %c0_7 = arith.constant 0 : index
    %6 = vector.load %arg3[%c0_6, %c0_7] : memref<1x128xf32, #tpu.memory_space<vmem>>, vector<1x128xf32>
    %7 = vector.broadcast %6 : vector<1x128xf32> to vector<128x128xf32>
    %8 = arith.addf %5, %7 : vector<128x128xf32>
    %cst_8 = arith.constant 0.000000e+00 : f32
    %9 = vector.broadcast %cst_8 : f32 to vector<128x128xf32>
    %10 = arith.maximumf %8, %9 : vector<128x128xf32>
    %11 = arith.truncf %10 : vector<128x128xf32> to vector<128x128xbf16>
    %c0_9 = arith.constant 0 : index
    %c0_10 = arith.constant 0 : index
    %12 = vector.load %arg4[%c0_9, %c0_10] : memref<128x128xbf16, #tpu.memory_space<vmem>>, vector<128x128xbf16>
    %cst_11 = arith.constant dense<0.000000e+00> : vector<128x128xf32>
    %13 = tpu.matmul %11, %12, %cst_11 {dimension_numbers = #tpu.dot_dimension_numbers<[1], [0], [0], [1], [0, 0, 1, 1], [], []>} : vector<128x128xbf16>, vector<128x128xbf16>, vector<128x128xf32> -> vector<128x128xf32>
    %c0_12 = arith.constant 0 : index
    %c0_13 = arith.constant 0 : index
    %14 = vector.load %arg1[%c0_12, %c0_13] : memref<128x128xbf16, #tpu.memory_space<vmem>>, vector<128x128xbf16>
    %15 = arith.truncf %13 : vector<128x128xf32> to vector<128x128xbf16>
    %cst_14 = arith.constant dense<0.000000e+00> : vector<128x128xf32>
    %16 = tpu.matmul %14, %15, %cst_14 {dimension_numbers = #tpu.dot_dimension_numbers<[1], [0], [0], [1], [0, 0, 1, 1], [], []>} : vector<128x128xbf16>, vector<128x128xbf16>, vector<128x128xf32> -> vector<128x128xf32>
    %c0_15 = arith.constant 0 : index
    %c0_16 = arith.constant 0 : index
    %17 = vector.load %arg5[%c0_15, %c0_16] : memref<1x128xf32, #tpu.memory_space<vmem>>, vector<1x128xf32>
    %18 = vector.broadcast %17 : vector<1x128xf32> to vector<128x128xf32>
    %19 = arith.addf %16, %18 : vector<128x128xf32>
    %c0_17 = arith.constant 0 : index
    %c0_18 = arith.constant 0 : index
    %20 = vector.load %arg6[%c0_17, %c0_18] : memref<128x128xf32, #tpu.memory_space<vmem>>, vector<128x128xf32>
    tpu.vector_store %arg6[%c0_17, %c0_18], %19 {strides = array<i32>} : memref<128x128xf32, #tpu.memory_space<vmem>>, vector<128x128xf32>,
    return
  }
}

</mosaic_0001>

<bundles_post_ra>
// kernel: gcn_forward.1
= control target key start
LH: loop header
LB: loop body
LE: loop exit
PB: predicated region body
PF: predicated region fallthrough
CT: control target
= control target key end

     0   :  { %s1217_s2 = inlined_call_operand.vmem [shape: bf16[128,128], index: 2, kind: input, shape index: {}]   ;;  %s1218_s0 = inlined_call_operand.vmem [shape: bf16[128,128], index: 0, kind: input, shape index: {}]   ;;  %s1219_s1 = inlined_call_operand.vmem [shape: bf16[128,128], index: 1, kind: input, shape index: {}]   ;;  %s1220_s4 = inlined_call_operand.vmem [shape: bf16[128,128], index: 4, kind: input, shape index: {}]   ;;  %s1221_s3 = inlined_call_operand.vmem [shape: f32[1,128], index: 3, kind: input, shape index: {}]   ;;  %s1222_s5 = inlined_call_operand.vmem [shape: f32[1,128], index: 5, kind: input, shape index: {}]   ;;  %s1223_s6 = inlined_call_operand.vmem [shape: f32[128,128], index: 6, kind: output, shape index: {}]  }
   0x1   :  { %v968_v0 = vld [vmem:[%s1217_s2] sm:$0xff]   ;;  %v969_v1 = vld [vmem:[%s1217_s2 + $0x8] sm:$0xff]   ;;  %v970_v2 = vld [vmem:[%s1217_s2 + $0x10] sm:$0xff]  }
   0x2   :  { %840 = vmatprep.subr.bf16.mxu0 %v968_v0  ;;  %v971_v3 = vld [vmem:[%s1217_s2 + $0x18] sm:$0xff]   ;;  %v976_v4 = vld [vmem:[%s1218_s0] sm:$0xff]   ;;  %v973_v6 = vld [vmem:[%s1217_s2 + $0x28] sm:$0xff]  }
   0x3   :  { %841 = vmatpush3.bf16.msra.mxu0 %v968_v0  ;;  %856 = vmatprep.mubr.bf16.mxu0 %v976_v4  ;;  %v972_v5 = vld [vmem:[%s1217_s2 + $0x20] sm:$0xff]   ;;  %v974_v7 = vld [vmem:[%s1217_s2 + $0x30] sm:$0xff]   ;;  %v975_v8 = vld [vmem:[%s1217_s2 + $0x38] sm:$0xff]  }
   0x4   :  { %842 = vmatprep.subr.bf16.mxu0 %v969_v1  ;;  %v977_v9 = vld [vmem:[%s1218_s0 + $0x8] sm:$0xff]   ;;  %v978_v10 = vld [vmem:[%s1218_s0 + $0x10] sm:$0xff]   ;;  %v979_v11 = vld [vmem:[%s1218_s0 + $0x18] sm:$0xff]  }
   0x5   :  { %v980_v12 = vld [vmem:[%s1218_s0 + $0x20] sm:$0xff]   ;;  %v981_v13 = vld [vmem:[%s1218_s0 + $0x28] sm:$0xff]   ;;  %v982_v14 = vld [vmem:[%s1218_s0 + $0x30] sm:$0xff]  }
   0x6   :  { %v983_v15 = vld [vmem:[%s1218_s0 + $0x38] sm:$0xff]   ;;  %v1086_v16 = vld [vmem:[%s1219_s1] sm:$0xff]   ;;  %v993_v18 = vld [vmem:[%s1220_s4 + $0x8] sm:$0xff]  }
   0x7   :  { %843 = vmatpush3.bf16.msra.mxu0 %v969_v1  ;;  %888 = vmatprep.mubr.bf16.mxu1 %v1086_v16  ;;  %v992_v17 = vld [vmem:[%s1220_s4] sm:$0xff]   ;;  %v994_v19 = vld [vmem:[%s1220_s4 + $0x10] sm:$0xff]   ;;  %v995_v20 = vld [vmem:[%s1220_s4 + $0x18] sm:$0xff]  }
   0x8   :  { %844 = vmatprep.subr.bf16.mxu0 %v970_v2  ;;  %v996_v21 = vld [vmem:[%s1220_s4 + $0x20] sm:$0xff]   ;;  %v997_v22 = vld [vmem:[%s1220_s4 + $0x28] sm:$0xff]   ;;  %v1115_v48 = vld [vmem:[%s1219_s1 + $0x10] sm:$0xff]  }
   0x9   :  { %v1110_v47 = vld [vmem:[%s1219_s1 + $0x8] sm:$0xff]   ;;  %v1122_v49 = vld [vmem:[%s1219_s1 + $0x18] sm:$0xff]   ;;  %v1127_v50 = vld [vmem:[%s1219_s1 + $0x20] sm:$0xff]  }
   0xa   :  { %v1134_v51 = vld [vmem:[%s1219_s1 + $0x28] sm:$0xff]   ;;  %v1139_v52 = vld [vmem:[%s1219_s1 + $0x30] sm:$0xff]   ;;  %v1146_v53 = vld [vmem:[%s1219_s1 + $0x38] sm:$0xff]  }
   0xb   :  { %845 = vmatpush3.bf16.msra.mxu0 %v970_v2  ;;  %v998_v54 = vld [vmem:[%s1220_s4 + $0x30] sm:$0xff]   ;;  %v999_v55 = vld [vmem:[%s1220_s4 + $0x38] sm:$0xff]   ;;  %v758_v56 = vld [vmem:[%s1221_s3] ss:$0 sm:$0xff] }
   0xc   :  { %846 = vmatprep.subr.bf16.mxu0 %v971_v3 }
   0xf   :  { %847 = vmatpush3.bf16.msra.mxu0 %v971_v3 }
  0x10   :  { %848 = vmatprep.subr.bf16.mxu0 %v972_v5 }
  0x13   :  { %849 = vmatpush3.bf16.msra.mxu0 %v972_v5 }
  0x14   :  { %850 = vmatprep.subr.bf16.mxu0 %v973_v6 }
  0x17   :  { %851 = vmatpush3.bf16.msra.mxu0 %v973_v6 }
  0x18   :  { %852 = vmatprep.subr.bf16.mxu0 %v974_v7 }
  0x1b   :  { %853 = vmatpush3.bf16.msra.mxu0 %v974_v7 }
  0x1c   :  { %854 = vmatprep.subr.bf16.mxu0 %v975_v8 }
  0x1f   :  { %855 = vmatpush3.bf16.msra.mxu0 %v975_v8 }
  0x20   :  { %904 = vmatprep.subr.bf16.mxu0 %v992_v17 }
  0x22   :  { %857 = vmatmul.mubr.bf16.vlgmr.msra.gmra.mrb[0].mxu0 %v977_v9 }
  0x23   :  { %860 = vmatprep.mubr.bf16.mxu0 %v978_v10  ;;  %905 = vmatpush3.bf16.msra.mxu0 %v992_v17 }
  0x24   :  { %906 = vmatprep.subr.bf16.mxu0 %v993_v18 }
  0x27   :  { %907 = vmatpush3.bf16.msra.mxu0 %v993_v18 }
  0x28   :  { %908 = vmatprep.subr.bf16.mxu0 %v994_v19 }
  0x2a   :  { %861 = vmatmul.mubr.bf16.gmra.mrb[4].mxu0 %v979_v11 }
  0x2b   :  { %864 = vmatprep.mubr.bf16.mxu0 %v980_v12  ;;  %909 = vmatpush3.bf16.msra.mxu0 %v994_v19 }
  0x2c   :  { %910 = vmatprep.subr.bf16.mxu0 %v995_v20 }
  0x2f   :  { %911 = vmatpush3.bf16.msra.mxu0 %v995_v20 }
  0x30   :  { %912 = vmatprep.subr.bf16.mxu0 %v996_v21 }
  0x32   :  { %865 = vmatmul.mubr.bf16.gmra.mrb[8].mxu0 %v981_v13 }
  0x33   :  { %868 = vmatprep.mubr.bf16.mxu0 %v982_v14  ;;  %913 = vmatpush3.bf16.msra.mxu0 %v996_v21 }
  0x34   :  { %914 = vmatprep.subr.bf16.mxu0 %v997_v22 }
  0x37   :  { %915 = vmatpush3.bf16.msra.mxu0 %v997_v22 }
  0x38   :  { %916 = vmatprep.subr.bf16.mxu0 %v998_v54 }
  0x3a   :  { %869 = vmatmul.mubr.bf16.gmra.mrb[12].mxu0 %v983_v15 }
  0x3b   :  { %917 = vmatpush3.bf16.msra.mxu0 %v998_v54 }
  0x3c   :  { %918 = vmatprep.subr.bf16.mxu0 %v999_v55 }
  0x3f   :  { %919 = vmatpush3.bf16.msra.mxu0 %v999_v55 }
  0xf5   :  { %v858_v23 = vpop.f32.mrb[0].mxu0 }
  0xf6   :  { %v186_v24 = vpop.f32.mrb[1].mxu0 }
  0xf7   :  { %v859_v25 = vpop.f32.mrb[2].mxu0 }
  0xf8   :  { %v266_v26 = vpack.c.bf16 %v859_v25, %v858_v23  ;;  %v189_v27 = vpop.f32.mrb[3].mxu0 }
  0xf9   :  { %v265_v28 = vpack.c.bf16 %v189_v27, %v186_v24 }
  0xfb   :  { %872 = vmatprep.subr.bf16.mxu1 %v265_v28 }
  0xfc   :  { %873 = vmatpush3.bf16.msra.mxu1 %v265_v28 }
  0xfd   :  { %v862_v29 = vpop.f32.mrb[4].mxu0  ;;  %874 = vmatprep.subr.bf16.mxu1 %v266_v26 }
  0xfe   :  { %v202_v30 = vpop.f32.mrb[5].mxu0 }
  0xff   :  { %v863_v31 = vpop.f32.mrb[6].mxu0 }
 0x100   :  { %v268_v32 = vpack.c.bf16 %v863_v31, %v862_v29  ;;  %v205_v33 = vpop.f32.mrb[7].mxu0  ;;  %875 = vmatpush3.bf16.msra.mxu1 %v266_v26 }
 0x101   :  { %v267_v34 = vpack.c.bf16 %v205_v33, %v202_v30 }
 0x103   :  { %876 = vmatprep.subr.bf16.mxu1 %v267_v34 }
 0x104   :  { %877 = vmatpush3.bf16.msra.mxu1 %v267_v34 }
 0x105   :  { %v866_v35 = vpop.f32.mrb[8].mxu0  ;;  %878 = vmatprep.subr.bf16.mxu1 %v268_v32 }
 0x106   :  { %v218_v36 = vpop.f32.mrb[9].mxu0 }
 0x107   :  { %v867_v37 = vpop.f32.mrb[10].mxu0 }
 0x108   :  { %v270_v38 = vpack.c.bf16 %v867_v37, %v866_v35  ;;  %v221_v39 = vpop.f32.mrb[11].mxu0  ;;  %879 = vmatpush3.bf16.msra.mxu1 %v268_v32 }
 0x109   :  { %v269_v40 = vpack.c.bf16 %v221_v39, %v218_v36 }
 0x10b   :  { %880 = vmatprep.subr.bf16.mxu1 %v269_v40 }
 0x10c   :  { %881 = vmatpush3.bf16.msra.mxu1 %v269_v40 }
 0x10d   :  { %v870_v41 = vpop.f32.mrb[12].mxu0  ;;  %882 = vmatprep.subr.bf16.mxu1 %v270_v38 }
 0x10e   :  { %v234_v42 = vpop.f32.mrb[13].mxu0 }
 0x10f   :  { %v871_v43 = vpop.f32.mrb[14].mxu0 }
 0x110   :  { %v272_v44 = vpack.c.bf16 %v871_v43, %v870_v41  ;;  %v237_v45 = vpop.f32.mrb[15].mxu0  ;;  %883 = vmatpush3.bf16.msra.mxu1 %v270_v38 }
 0x111   :  { %v271_v46 = vpack.c.bf16 %v237_v45, %v234_v42 }
 0x113   :  { %884 = vmatprep.subr.bf16.mxu1 %v271_v46 }
 0x114   :  { %885 = vmatpush3.bf16.msra.mxu1 %v271_v46 }
 0x115   :  { %886 = vmatprep.subr.bf16.mxu1 %v272_v44 }
 0x118   :  { %887 = vmatpush3.bf16.msra.mxu1 %v272_v44 }
 0x11b   :  { %889 = vmatmul.mubr.bf16.vlgmr.msra.gmra.mrb[0].mxu1 %v1110_v47 }
 0x11c   :  { %892 = vmatprep.mubr.bf16.mxu1 %v1115_v48 }
 0x123   :  { %893 = vmatmul.mubr.bf16.gmra.mrb[4].mxu1 %v1122_v49 }
 0x124   :  { %896 = vmatprep.mubr.bf16.mxu1 %v1127_v50 }
 0x12b   :  { %897 = vmatmul.mubr.bf16.gmra.mrb[8].mxu1 %v1134_v51 }
 0x12c   :  { %900 = vmatprep.mubr.bf16.mxu1 %v1139_v52 }
 0x133   :  { %901 = vmatmul.mubr.bf16.gmra.mrb[12].mxu1 %v1146_v53 }
 0x134   :  { %952 = vmatprep.mubr.bf16.mxu1 %v1086_v16 }
 0x1ee   :  { %v890_v57 = vpop.f32.mrb[0].mxu1 }
 0x1ef   :  { %v371_v58 = vadd.f32 %v890_v57, %v758_v56  ;;  %v362_v59 = vpop.f32.mrb[1].mxu1 }
 0x1f0   :  { %v363_v60 = vadd.f32 %v758_v56, %v362_v59  ;;  %v891_v61 = vpop.f32.mrb[2].mxu1 }
 0x1f1   :  { %v374_v62 = vadd.f32 %v891_v61, %v758_v56  ;;  %v365_v63 = vpop.f32.mrb[3].mxu1  ;;  %v427_v1 = vmax.f32 %v371_v58, 0.0 }
 0x1f2   :  { %v366_v0 = vadd.f32 %v758_v56, %v365_v63  ;;  %v425_v3 = vmax.f32 %v363_v60, 0.0 }
 0x1f3   :  { %v428_v2 = vmax.f32 %v374_v62, 0.0 }
 0x1f4   :  { %v426_v4 = vmax.f32 %v366_v0, 0.0 }
 0x1f5   :  { %v442_v5 = vpack.c.bf16 %v428_v2, %v427_v1 }
 0x1f6   :  { %v441_v6 = vpack.c.bf16 %v426_v4, %v425_v3  ;;  %v894_v7 = vpop.f32.mrb[4].mxu1 }
 0x1f7   :  { %v387_v8 = vadd.f32 %v894_v7, %v758_v56  ;;  %v378_v9 = vpop.f32.mrb[5].mxu1 }
 0x1f8   :  { %v379_v10 = vadd.f32 %v758_v56, %v378_v9  ;;  %v895_v11 = vpop.f32.mrb[6].mxu1  ;;  %920 = vmatprep.mubr.bf16.mxu0 %v441_v6 }
 0x1f9   :  { %v390_v12 = vadd.f32 %v895_v11, %v758_v56  ;;  %v381_v13 = vpop.f32.mrb[7].mxu1  ;;  %921 = vmatmul.mubr.bf16.vlgmr.msra.gmra.mrb[16].mxu0 %v442_v5  ;;  %v431_v15 = vmax.f32 %v387_v8, 0.0 }
 0x1fa   :  { %v382_v14 = vadd.f32 %v758_v56, %v381_v13  ;;  %v429_v17 = vmax.f32 %v379_v10, 0.0 }
 0x1fb   :  { %v432_v16 = vmax.f32 %v390_v12, 0.0 }
 0x1fc   :  { %v430_v18 = vmax.f32 %v382_v14, 0.0 }
 0x1fd   :  { %v444_v19 = vpack.c.bf16 %v432_v16, %v431_v15  ;;  %v775_v16 = vld [vmem:[%s1222_s5] ss:$0 sm:$0xff] }
 0x1fe   :  { %v443_v20 = vpack.c.bf16 %v430_v18, %v429_v17  ;;  %v898_v21 = vpop.f32.mrb[8].mxu1 }
 0x1ff   :  { %v403_v22 = vadd.f32 %v898_v21, %v758_v56  ;;  %v394_v23 = vpop.f32.mrb[9].mxu1 }
 0x200   :  { %v395_v24 = vadd.f32 %v758_v56, %v394_v23  ;;  %v899_v25 = vpop.f32.mrb[10].mxu1  ;;  %924 = vmatprep.mubr.bf16.mxu0 %v443_v20 }
 0x201   :  { %v406_v26 = vadd.f32 %v899_v25, %v758_v56  ;;  %v397_v27 = vpop.f32.mrb[11].mxu1  ;;  %925 = vmatmul.mubr.bf16.gmra.mrb[20].mxu0 %v444_v19  ;;  %v435_v29 = vmax.f32 %v403_v22, 0.0 }
 0x202   :  { %v398_v28 = vadd.f32 %v758_v56, %v397_v27  ;;  %v433_v31 = vmax.f32 %v395_v24, 0.0 }
 0x203   :  { %v436_v30 = vmax.f32 %v406_v26, 0.0 }
 0x204   :  { %v434_v32 = vmax.f32 %v398_v28, 0.0 }
 0x205   :  { %v446_v33 = vpack.c.bf16 %v436_v30, %v435_v29 }
 0x206   :  { %v445_v34 = vpack.c.bf16 %v434_v32, %v433_v31  ;;  %v902_v35 = vpop.f32.mrb[12].mxu1 }
 0x207   :  { %v419_v36 = vadd.f32 %v902_v35, %v758_v56  ;;  %v410_v37 = vpop.f32.mrb[13].mxu1 }
 0x208   :  { %v411_v38 = vadd.f32 %v758_v56, %v410_v37  ;;  %v903_v39 = vpop.f32.mrb[14].mxu1  ;;  %928 = vmatprep.mubr.bf16.mxu0 %v445_v34 }
 0x209   :  { %v422_v40 = vadd.f32 %v903_v39, %v758_v56  ;;  %v413_v41 = vpop.f32.mrb[15].mxu1  ;;  %929 = vmatmul.mubr.bf16.gmra.mrb[24].mxu0 %v446_v33  ;;  %v439_v43 = vmax.f32 %v419_v36, 0.0 }
 0x20a   :  { %v414_v42 = vadd.f32 %v758_v56, %v413_v41  ;;  %v437_v45 = vmax.f32 %v411_v38, 0.0 }
 0x20b   :  { %v440_v44 = vmax.f32 %v422_v40, 0.0 }
 0x20c   :  { %v438_v46 = vmax.f32 %v414_v42, 0.0 }
 0x20d   :  { %v448_v54 = vpack.c.bf16 %v440_v44, %v439_v43 }
 0x20e   :  { %v447_v55 = vpack.c.bf16 %v438_v46, %v437_v45 }
 0x210   :  { %932 = vmatprep.mubr.bf16.mxu0 %v447_v55 }
 0x211   :  { %933 = vmatmul.mubr.bf16.gmra.mrb[28].mxu0 %v448_v54 }
 0x2cc   :  { %v922_v57 = vpop.f32.mrb[16].mxu0 }
 0x2cd   :  { %v547_v58 = vpop.f32.mrb[17].mxu0 }
 0x2ce   :  { %v923_v59 = vpop.f32.mrb[18].mxu0 }
 0x2cf   :  { %v611_v60 = vpack.c.bf16 %v923_v59, %v922_v57  ;;  %v550_v61 = vpop.f32.mrb[19].mxu0 }
 0x2d0   :  { %v610_v62 = vpack.c.bf16 %v550_v61, %v547_v58 }
 0x2d2   :  { %936 = vmatprep.subr.bf16.mxu1 %v610_v62 }
 0x2d3   :  { %937 = vmatpush3.bf16.msra.mxu1 %v610_v62 }
 0x2d4   :  { %v926_v63 = vpop.f32.mrb[20].mxu0  ;;  %938 = vmatprep.subr.bf16.mxu1 %v611_v60 }
 0x2d5   :  { %v563_v0 = vpop.f32.mrb[21].mxu0 }
 0x2d6   :  { %v927_v56 = vpop.f32.mrb[22].mxu0 }
 0x2d7   :  { %v613_v1 = vpack.c.bf16 %v927_v56, %v926_v63  ;;  %v566_v2 = vpop.f32.mrb[23].mxu0  ;;  %939 = vmatpush3.bf16.msra.mxu1 %v611_v60 }
 0x2d8   :  { %v612_v3 = vpack.c.bf16 %v566_v2, %v563_v0 }
 0x2da   :  { %940 = vmatprep.subr.bf16.mxu1 %v612_v3 }
 0x2db   :  { %941 = vmatpush3.bf16.msra.mxu1 %v612_v3 }
 0x2dc   :  { %v930_v4 = vpop.f32.mrb[24].mxu0  ;;  %942 = vmatprep.subr.bf16.mxu1 %v613_v1 }
 0x2dd   :  { %v579_v5 = vpop.f32.mrb[25].mxu0 }
 0x2de   :  { %v931_v6 = vpop.f32.mrb[26].mxu0 }
 0x2df   :  { %v615_v7 = vpack.c.bf16 %v931_v6, %v930_v4  ;;  %v582_v8 = vpop.f32.mrb[27].mxu0  ;;  %943 = vmatpush3.bf16.msra.mxu1 %v613_v1 }
 0x2e0   :  { %v614_v9 = vpack.c.bf16 %v582_v8, %v579_v5 }
 0x2e2   :  { %944 = vmatprep.subr.bf16.mxu1 %v614_v9 }
 0x2e3   :  { %945 = vmatpush3.bf16.msra.mxu1 %v614_v9 }
 0x2e4   :  { %v934_v10 = vpop.f32.mrb[28].mxu0  ;;  %946 = vmatprep.subr.bf16.mxu1 %v615_v7 }
 0x2e5   :  { %v595_v11 = vpop.f32.mrb[29].mxu0 }
 0x2e6   :  { %v935_v12 = vpop.f32.mrb[30].mxu0 }
 0x2e7   :  { %v617_v13 = vpack.c.bf16 %v935_v12, %v934_v10  ;;  %v598_v14 = vpop.f32.mrb[31].mxu0  ;;  %947 = vmatpush3.bf16.msra.mxu1 %v615_v7 }
 0x2e8   :  { %v616_v15 = vpack.c.bf16 %v598_v14, %v595_v11 }
 0x2ea   :  { %948 = vmatprep.subr.bf16.mxu1 %v616_v15 }
 0x2eb   :  { %949 = vmatpush3.bf16.msra.mxu1 %v616_v15 }
 0x2ec   :  { %950 = vmatprep.subr.bf16.mxu1 %v617_v13 }
 0x2ef   :  { %951 = vmatpush3.bf16.msra.mxu1 %v617_v13 }
 0x2f2   :  { %953 = vmatmul.mubr.bf16.vlgmr.msra.gmra.mrb[16].mxu1 %v1110_v47 }
 0x2f3   :  { %956 = vmatprep.mubr.bf16.mxu1 %v1115_v48 }
 0x2fa   :  { %957 = vmatmul.mubr.bf16.gmra.mrb[20].mxu1 %v1122_v49 }
 0x2fb   :  { %960 = vmatprep.mubr.bf16.mxu1 %v1127_v50 }
 0x302   :  { %961 = vmatmul.mubr.bf16.gmra.mrb[24].mxu1 %v1134_v51 }
 0x303   :  { %964 = vmatprep.mubr.bf16.mxu1 %v1139_v52 }
 0x30a   :  { %965 = vmatmul.mubr.bf16.gmra.mrb[28].mxu1 %v1146_v53 }
 0x3c5   :  { %v954_v17 = vpop.f32.mrb[16].mxu1 }
 0x3c6   :  { %v668_v18 = vadd.f32 %v954_v17, %v775_v16  ;;  %v659_v19 = vpop.f32.mrb[17].mxu1 }
 0x3c7   :  { %v660_v47 = vadd.f32 %v775_v16, %v659_v19  ;;  %v955_v20 = vpop.f32.mrb[18].mxu1 }
 0x3c8   :  { %724 = vst [vmem:[%s1223_s6 + $0x10] sm:$0xff] %v668_v18  ;;  %v671_v48 = vadd.f32 %v955_v20, %v775_v16  ;;  %v662_v49 = vpop.f32.mrb[19].mxu1 }
 0x3c9   :  { %722 = vst [vmem:[%s1223_s6] sm:$0xff] %v660_v47  ;;  %v663_v50 = vadd.f32 %v775_v16, %v662_v49 }
 0x3ca   :  { %725 = vst [vmem:[%s1223_s6 + $0x18] sm:$0xff] %v671_v48 }
 0x3cb   :  { %723 = vst [vmem:[%s1223_s6 + $0x8] sm:$0xff] %v663_v50 }
 0x3cd   :  { %v958_v51 = vpop.f32.mrb[20].mxu1 }
 0x3ce   :  { %v684_v52 = vadd.f32 %v958_v51, %v775_v16  ;;  %v675_v53 = vpop.f32.mrb[21].mxu1 }
 0x3cf   :  { %v676_v21 = vadd.f32 %v775_v16, %v675_v53  ;;  %v959_v22 = vpop.f32.mrb[22].mxu1 }
 0x3d0   :  { %728 = vst [vmem:[%s1223_s6 + $0x30] sm:$0xff] %v684_v52  ;;  %v687_v23 = vadd.f32 %v959_v22, %v775_v16  ;;  %v678_v24 = vpop.f32.mrb[23].mxu1 }
 0x3d1   :  { %726 = vst [vmem:[%s1223_s6 + $0x20] sm:$0xff] %v676_v21  ;;  %v679_v25 = vadd.f32 %v775_v16, %v678_v24 }
 0x3d2   :  { %729 = vst [vmem:[%s1223_s6 + $0x38] sm:$0xff] %v687_v23 }
 0x3d3   :  { %727 = vst [vmem:[%s1223_s6 + $0x28] sm:$0xff] %v679_v25 }
 0x3d5   :  { %v962_v26 = vpop.f32.mrb[24].mxu1 }
 0x3d6   :  { %v700_v27 = vadd.f32 %v962_v26, %v775_v16  ;;  %v691_v28 = vpop.f32.mrb[25].mxu1 }
 0x3d7   :  { %v692_v29 = vadd.f32 %v775_v16, %v691_v28  ;;  %v963_v30 = vpop.f32.mrb[26].mxu1 }
 0x3d8   :  { %732 = vst [vmem:[%s1223_s6 + $0x50] sm:$0xff] %v700_v27  ;;  %v703_v31 = vadd.f32 %v963_v30, %v775_v16  ;;  %v694_v32 = vpop.f32.mrb[27].mxu1 }
 0x3d9   :  { %730 = vst [vmem:[%s1223_s6 + $0x40] sm:$0xff] %v692_v29  ;;  %v695_v33 = vadd.f32 %v775_v16, %v694_v32 }
 0x3da   :  { %733 = vst [vmem:[%s1223_s6 + $0x58] sm:$0xff] %v703_v31 }
 0x3db   :  { %731 = vst [vmem:[%s1223_s6 + $0x48] sm:$0xff] %v695_v33 }
 0x3dd   :  { %v966_v34 = vpop.f32.mrb[28].mxu1 }
 0x3de   :  { %v716_v35 = vadd.f32 %v966_v34, %v775_v16  ;;  %v707_v36 = vpop.f32.mrb[29].mxu1 }
 0x3df   :  { %v708_v37 = vadd.f32 %v775_v16, %v707_v36  ;;  %v967_v38 = vpop.f32.mrb[30].mxu1 }
 0x3e0   :  { %736 = vst [vmem:[%s1223_s6 + $0x70] sm:$0xff] %v716_v35  ;;  %v719_v39 = vadd.f32 %v967_v38, %v775_v16  ;;  %v710_v40 = vpop.f32.mrb[31].mxu1 }
 0x3e1   :  { %734 = vst [vmem:[%s1223_s6 + $0x60] sm:$0xff] %v708_v37  ;;  %v711_v41 = vadd.f32 %v775_v16, %v710_v40 }
 0x3e2   :  { %737 = vst [vmem:[%s1223_s6 + $0x78] sm:$0xff] %v719_v39 }
 0x3e3   :  { %735 = vst [vmem:[%s1223_s6 + $0x68] sm:$0xff] %v711_v41 }

</bundles_post_ra>
